<compile_context>
chip_gen: v6e
topology: v6e:2x2x1
jax: 0.10.0
libtpu: 0.0.40
codegen_flags: <defaults>
</compile_context>

<pallas_src>
import numpy as np
import jax
import jax.numpy as jnp
from jax import lax
from jax.experimental import pallas as pl
from jax.experimental.pallas import tpu as pltpu


# ---------------------------------------------------------------------------
# Host-side random rectangle selection (faithful to the reference, including
# the width_ratio_range[0] quirk), made deterministic with a seeded RNG.
# ---------------------------------------------------------------------------
def random_float(rng, lo, hi):
    return rng.rand() * (hi - lo) + lo


def get_random_rectangle_inside(image_shape, height_ratio_range,
                                width_ratio_range, rng):
    image_height = image_shape[2]
    image_width = image_shape[3]
    remaining_height = int(np.rint(
        random_float(rng, height_ratio_range[0], height_ratio_range[1]) * image_height))
    # NB: reference uses width_ratio_range[0] for BOTH ends of the width draw —
    # reproduced as-is; do not "fix" (it would silently change semantics).
    remaining_width = int(np.rint(
        random_float(rng, width_ratio_range[0], width_ratio_range[0]) * image_width))
    if remaining_height == image_height:
        height_start = 0
    else:
        height_start = int(rng.randint(0, image_height - remaining_height))
    if remaining_width == image_width:
        width_start = 0
    else:
        width_start = int(rng.randint(0, image_width - remaining_width))
    return (height_start, height_start + remaining_height,
            width_start, width_start + remaining_width)


# ---------------------------------------------------------------------------
# Generation-dependent H-tile selection.
# ---------------------------------------------------------------------------
def _chip_generation():
    try:
        kind = jax.devices()[0].device_kind.lower()
    except Exception:
        return None
    for gen in (7, 6, 5):
        if "v%d" % gen in kind:
            return gen
    return None


def _largest_tile_h(H, max_th):
    """Largest divisor of H that is a multiple of 8 and <= max_th; else full H."""
    best = None
    for cand in range(8, min(H, max_th) + 1, 8):
        if H % cand == 0:
            best = cand
    return best if best is not None else H


def _pick_tile_h(H, N):
    gen = _chip_generation()
    if gen is not None and gen >= 7:
        max_th = H          # v7x: per-step overhead dominates; full-H tiles
    elif gen == 6:
        max_th = 128        # v6e: halve step count vs 64, negligible skip loss
    else:
        max_th = 64         # v5e / unknown: fine tiles, small scoped-VMEM use
    th = _largest_tile_h(H, max_th)
    # Keep at least 2 total grid steps so both TensorCores (v7x megacore)
    # get work on this "parallel"-only grid.
    if N * (H // th) < 2 and th % 16 == 0:
        th //= 2
    return th


# ---------------------------------------------------------------------------
# Pallas kernel factory: masked copy of four NCHW images, bounds in SMEM
# (scalar prefetch).  Grid = (batch, H-tiles); each step sees a (1,C,TH,W)
# tile.  band_skip=True adds the "fully outside crop band -> write zeros,
# never read input" fast path used with fine H tiling.
# ---------------------------------------------------------------------------
def _make_crop_kernel(band_skip):
    def kernel(bounds_ref,                        # SMEM: [h0, h1, w0, w1]
               c_ref, f_ref, s_ref, m_ref,        # inputs  (1, C, TH, W)
               oc_ref, of_ref, os_ref, om_ref):   # outputs (1, C, TH, W)
        h0 = bounds_ref[0]
        h1 = bounds_ref[1]
        w0 = bounds_ref[2]
        w1 = bounds_ref[3]

        _, _, TH, W = oc_ref.shape
        row0 = pl.program_id(1) * TH

        def masked_copy():
            # Mask computed once at (1,1,TH,W); broadcasts over C in jnp.where.
            mshape = (1, 1, TH, W)
            row_ids = row0 + lax.broadcasted_iota(jnp.int32, mshape, 2)
            col_ids = lax.broadcasted_iota(jnp.int32, mshape, 3)
            mask = (row_ids >= h0) & (row_ids < h1) & \
                   (col_ids >= w0) & (col_ids < w1)
            oc_ref[...] = jnp.where(mask, c_ref[...], jnp.zeros((), c_ref.dtype))
            of_ref[...] = jnp.where(mask, f_ref[...], jnp.zeros((), f_ref.dtype))
            os_ref[...] = jnp.where(mask, s_ref[...], jnp.zeros((), s_ref.dtype))
            om_ref[...] = jnp.where(mask, m_ref[...], jnp.zeros((), m_ref.dtype))

        if not band_skip:
            # Coarse / full-H tiles: always do the masked copy, no branching.
            masked_copy()
        else:
            intersects = (row0 < h1) & (row0 + TH > h0)

            @pl.when(intersects)
            def _():
                masked_copy()

            @pl.when(jnp.logical_not(intersects))
            def _():
                # Tile is fully outside the crop row-band: never touch inputs.
                oc_ref[...] = jnp.zeros_like(oc_ref)
                of_ref[...] = jnp.zeros_like(of_ref)
                os_ref[...] = jnp.zeros_like(os_ref)
                om_ref[...] = jnp.zeros_like(om_ref)

    return kernel


def crop_pallas(container, fake_image, secret_image, face_mask, bounds):
    """bounds: int32 array [h_start, h_end, w_start, w_end]."""
    N, C, H, W = container.shape
    TH = _pick_tile_h(H, N)
    n_h_tiles = H // TH
    band_skip = n_h_tiles > 1
    blk = (1, C, TH, W)

    def out_map(n, h, bounds_ref):
        return (n, 0, h, 0)

    if band_skip:
        def in_map(n, h, bounds_ref):
            # Clamp the H-tile index into the crop row-band. Tiles fully
            # outside the band map to an already-resident block (Pallas skips
            # the repeated input DMA); the kernel body never reads the input
            # for those tiles anyway, so correctness does not depend on the
            # elision.  Requires H to be the innermost (last) grid axis.
            th_c = np.int32(TH)
            lo_blk = lax.div(bounds_ref[0], th_c)
            hi_blk = lax.div(jnp.maximum(bounds_ref[1] - 1, 0), th_c)
            hi_blk = jnp.maximum(hi_blk, lo_blk)   # guard degenerate empty crop
            return (n, 0, jnp.clip(h, lo_blk, hi_blk), 0)
    else:
        in_map = out_map   # plain identity mapping, no clamp machinery

    in_spec = pl.BlockSpec(blk, in_map)
    out_spec = pl.BlockSpec(blk, out_map)
    out_shape = jax.ShapeDtypeStruct((N, C, H, W), container.dtype)

    grid_spec = pltpu.PrefetchScalarGridSpec(
        num_scalar_prefetch=1,
        grid=(N, n_h_tiles),                 # H innermost (see in_map note)
        in_specs=[in_spec, in_spec, in_spec, in_spec],
        out_specs=[out_spec, out_spec, out_spec, out_spec],
    )

    # 4 inputs + 4 outputs, double-buffered.  Only raise the scoped-VMEM
    # limit when the footprint could exceed the smallest (v5e, 16 MiB) default.
    itemsize = jnp.dtype(container.dtype).itemsize
    footprint = 8 * 2 * (C * TH * W * itemsize)
    cp_kwargs = dict(dimension_semantics=("parallel", "parallel"))
    if footprint > (12 << 20):
        cp_kwargs["vmem_limit_bytes"] = min(footprint + (8 << 20), 100 << 20)

    return pl.pallas_call(
        _make_crop_kernel(band_skip),
        grid_spec=grid_spec,
        out_shape=(out_shape, out_shape, out_shape, out_shape),
        compiler_params=pltpu.CompilerParams(**cp_kwargs),
    )(bounds, container, fake_image, secret_image, face_mask)


class Crop:
    """JAX/Pallas port of the PyTorch Crop noise layer."""

    def __init__(self, height_ratio_range, width_ratio_range, seed=0):
        self.height_ratio_range = height_ratio_range
        self.width_ratio_range = width_ratio_range
        self._rng = np.random.RandomState(seed)

    def __call__(self, container, fake_image, secret_image, face_mask):
        h_start, h_end, w_start, w_end = get_random_rectangle_inside(
            container.shape, self.height_ratio_range, self.width_ratio_range,
            self._rng)
        bounds = jnp.asarray([h_start, h_end, w_start, w_end], dtype=jnp.int32)
        # Return order matches the PyTorch forward:
        # (padded_container, padded_fake, padded_secret, padded_face_mask).
        return crop_pallas(container, fake_image, secret_image, face_mask,
                           bounds)


def _run_and_check(N, C, H, W, seed):
    key = jax.random.PRNGKey(0)
    k1, k2, k3, k4 = jax.random.split(key, 4)
    container    = jax.random.normal(k1, (N, C, H, W), dtype=jnp.float32)
    fake_image   = jax.random.normal(k2, (N, C, H, W), dtype=jnp.float32)
    secret_image = jax.random.normal(k3, (N, C, H, W), dtype=jnp.float32)
    face_mask    = jax.random.uniform(k4, (N, C, H, W), dtype=jnp.float32)

    crop = Crop(height_ratio_range=(0.5, 0.8), width_ratio_range=(0.5, 0.8),
                seed=seed)
    outs = jax.block_until_ready(
        crop(container, fake_image, secret_image, face_mask))

    # Pure-JAX reference with identical (replayed) bounds.
    h0, h1, w0, w1 = get_random_rectangle_inside(
        (N, C, H, W), (0.5, 0.8), (0.5, 0.8), np.random.RandomState(seed))
    hi = jnp.arange(H)[:, None]
    wi = jnp.arange(W)[None, :]
    mask = ((hi >= h0) & (hi < h1) & (wi >= w0) & (wi < w1))[None, None]
    for got, x in zip(outs, (container, fake_image, secret_image, face_mask)):
        ref = jnp.where(mask, x, 0.0)
        np.testing.assert_allclose(np.asarray(got), np.asarray(ref),
                                   rtol=0, atol=0)


if __name__ == "__main__":
    # Small NCHW shape consistent with the module (production is 4x3x256x256).
    _run_and_check(2, 3, 16, 16, seed=0)
    # Larger spatial size to exercise the H-tiled path (multiple H-tiles on
    # v5e/v6e -> clamped-input DMA skipping + zero-only branch; single tile
    # on v7x -> plain masked-copy path).
    _run_and_check(2, 3, 128, 128, seed=1)
    print("KERNEL_OK")
</pallas_src>

<mosaic_0001>
module attributes {stable_mosaic.version = 11 : i64} {
  func.func @kernel(%arg0: i32, %arg1: i32, %arg2: memref<4xi32, #tpu.memory_space<smem>>, %arg3: memref<1x3x16x16xf32, #tpu.memory_space<vmem>>, %arg4: memref<1x3x16x16xf32, #tpu.memory_space<vmem>>, %arg5: memref<1x3x16x16xf32, #tpu.memory_space<vmem>>, %arg6: memref<1x3x16x16xf32, #tpu.memory_space<vmem>>, %arg7: memref<1x3x16x16xf32, #tpu.memory_space<vmem>>, %arg8: memref<1x3x16x16xf32, #tpu.memory_space<vmem>>, %arg9: memref<1x3x16x16xf32, #tpu.memory_space<vmem>>, %arg10: memref<1x3x16x16xf32, #tpu.memory_space<vmem>>) attributes {dimension_semantics = [#tpu.dimension_semantics<parallel>, #tpu.dimension_semantics<parallel>], iteration_bounds = array<i64: 2, 1>, scalar_prefetch = 1 : i64, scratch_operands = 0 : i64, tpu.core_type = #tpu.core_type<tc>, window_params = [{transform_indices = @transform_0, window_bounds = array<i64: 1, 3, 16, 16>}, {transform_indices = @transform_1, window_bounds = array<i64: 1, 3, 16, 16>}, {transform_indices = @transform_2, window_bounds = array<i64: 1, 3, 16, 16>}, {transform_indices = @transform_3, window_bounds = array<i64: 1, 3, 16, 16>}, {transform_indices = @transform_4, window_bounds = array<i64: 1, 3, 16, 16>}, {transform_indices = @transform_5, window_bounds = array<i64: 1, 3, 16, 16>}, {transform_indices = @transform_6, window_bounds = array<i64: 1, 3, 16, 16>}, {transform_indices = @transform_7, window_bounds = array<i64: 1, 3, 16, 16>}]} {
    %c0 = arith.constant 0 : index
    %0 = memref.load %arg2[%c0] : memref<4xi32, #tpu.memory_space<smem>>
    %c1 = arith.constant 1 : index
    %1 = memref.load %arg2[%c1] : memref<4xi32, #tpu.memory_space<smem>>
    %c2 = arith.constant 2 : index
    %2 = memref.load %arg2[%c2] : memref<4xi32, #tpu.memory_space<smem>>
    %c3 = arith.constant 3 : index
    %3 = memref.load %arg2[%c3] : memref<4xi32, #tpu.memory_space<smem>>
    %c16_i32 = arith.constant 16 : i32
    %4 = arith.muli %arg1, %c16_i32 : i32
    %5 = tpu.iota {dimensions = array<i32: 2>} : vector<1x1x16x16xi32>
    %6 = vector.broadcast %4 : i32 to vector<1x1x16x16xi32>
    %7 = arith.addi %6, %5 : vector<1x1x16x16xi32>
    %8 = tpu.iota {dimensions = array<i32: 3>} : vector<1x1x16x16xi32>
    %9 = vector.broadcast %0 : i32 to vector<1x1x16x16xi32>
    %10 = arith.cmpi sge, %7, %9 : vector<1x1x16x16xi32>
    %11 = vector.broadcast %1 : i32 to vector<1x1x16x16xi32>
    %12 = arith.cmpi slt, %7, %11 : vector<1x1x16x16xi32>
    %13 = arith.andi %10, %12 : vector<1x1x16x16xi1>
    %14 = vector.broadcast %2 : i32 to vector<1x1x16x16xi32>
    %15 = arith.cmpi sge, %8, %14 : vector<1x1x16x16xi32>
    %16 = arith.andi %13, %15 : vector<1x1x16x16xi1>
    %17 = vector.broadcast %3 : i32 to vector<1x1x16x16xi32>
    %18 = arith.cmpi slt, %8, %17 : vector<1x1x16x16xi32>
    %19 = arith.andi %16, %18 : vector<1x1x16x16xi1>
    %c0_0 = arith.constant 0 : index
    %c0_1 = arith.constant 0 : index
    %c0_2 = arith.constant 0 : index
    %c0_3 = arith.constant 0 : index
    %20 = vector.load %arg3[%c0_0, %c0_1, %c0_2, %c0_3] : memref<1x3x16x16xf32, #tpu.memory_space<vmem>>, vector<1x3x16x16xf32>
    %cst = arith.constant 0.000000e+00 : f32
    %21 = vector.shape_cast %19 : vector<1x1x16x16xi1> to vector<1x1x16x16xi1>
    %22 = vector.broadcast %21 : vector<1x1x16x16xi1> to vector<1x3x16x16xi1>
    %23 = vector.broadcast %cst : f32 to vector<1x3x16x16xf32>
    %24 = arith.select %22, %20, %23 : vector<1x3x16x16xi1>, vector<1x3x16x16xf32>
    %c0_4 = arith.constant 0 : index
    %c0_5 = arith.constant 0 : index
    %c0_6 = arith.constant 0 : index
    %c0_7 = arith.constant 0 : index
    %25 = vector.load %arg7[%c0_4, %c0_5, %c0_6, %c0_7] : memref<1x3x16x16xf32, #tpu.memory_space<vmem>>, vector<1x3x16x16xf32>
    tpu.vector_store %arg7[%c0_4, %c0_5, %c0_6, %c0_7], %24 {strides = array<i32>} : memref<1x3x16x16xf32, #tpu.memory_space<vmem>>, vector<1x3x16x16xf32>,
    %c0_8 = arith.constant 0 : index
    %c0_9 = arith.constant 0 : index
    %c0_10 = arith.constant 0 : index
    %c0_11 = arith.constant 0 : index
    %26 = vector.load %arg4[%c0_8, %c0_9, %c0_10, %c0_11] : memref<1x3x16x16xf32, #tpu.memory_space<vmem>>, vector<1x3x16x16xf32>
    %cst_12 = arith.constant 0.000000e+00 : f32
    %27 = vector.shape_cast %19 : vector<1x1x16x16xi1> to vector<1x1x16x16xi1>
    %28 = vector.broadcast %27 : vector<1x1x16x16xi1> to vector<1x3x16x16xi1>
    %29 = vector.broadcast %cst_12 : f32 to vector<1x3x16x16xf32>
    %30 = arith.select %28, %26, %29 : vector<1x3x16x16xi1>, vector<1x3x16x16xf32>
    %c0_13 = arith.constant 0 : index
    %c0_14 = arith.constant 0 : index
    %c0_15 = arith.constant 0 : index
    %c0_16 = arith.constant 0 : index
    %31 = vector.load %arg8[%c0_13, %c0_14, %c0_15, %c0_16] : memref<1x3x16x16xf32, #tpu.memory_space<vmem>>, vector<1x3x16x16xf32>
    tpu.vector_store %arg8[%c0_13, %c0_14, %c0_15, %c0_16], %30 {strides = array<i32>} : memref<1x3x16x16xf32, #tpu.memory_space<vmem>>, vector<1x3x16x16xf32>,
    %c0_17 = arith.constant 0 : index
    %c0_18 = arith.constant 0 : index
    %c0_19 = arith.constant 0 : index
    %c0_20 = arith.constant 0 : index
    %32 = vector.load %arg5[%c0_17, %c0_18, %c0_19, %c0_20] : memref<1x3x16x16xf32, #tpu.memory_space<vmem>>, vector<1x3x16x16xf32>
    %cst_21 = arith.constant 0.000000e+00 : f32
    %33 = vector.shape_cast %19 : vector<1x1x16x16xi1> to vector<1x1x16x16xi1>
    %34 = vector.broadcast %33 : vector<1x1x16x16xi1> to vector<1x3x16x16xi1>
    %35 = vector.broadcast %cst_21 : f32 to vector<1x3x16x16xf32>
    %36 = arith.select %34, %32, %35 : vector<1x3x16x16xi1>, vector<1x3x16x16xf32>
    %c0_22 = arith.constant 0 : index
    %c0_23 = arith.constant 0 : index
    %c0_24 = arith.constant 0 : index
    %c0_25 = arith.constant 0 : index
    %37 = vector.load %arg9[%c0_22, %c0_23, %c0_24, %c0_25] : memref<1x3x16x16xf32, #tpu.memory_space<vmem>>, vector<1x3x16x16xf32>
    tpu.vector_store %arg9[%c0_22, %c0_23, %c0_24, %c0_25], %36 {strides = array<i32>} : memref<1x3x16x16xf32, #tpu.memory_space<vmem>>, vector<1x3x16x16xf32>,
    %c0_26 = arith.constant 0 : index
    %c0_27 = arith.constant 0 : index
    %c0_28 = arith.constant 0 : index
    %c0_29 = arith.constant 0 : index
    %38 = vector.load %arg6[%c0_26, %c0_27, %c0_28, %c0_29] : memref<1x3x16x16xf32, #tpu.memory_space<vmem>>, vector<1x3x16x16xf32>
    %cst_30 = arith.constant 0.000000e+00 : f32
    %39 = vector.shape_cast %19 : vector<1x1x16x16xi1> to vector<1x1x16x16xi1>
    %40 = vector.broadcast %39 : vector<1x1x16x16xi1> to vector<1x3x16x16xi1>
    %41 = vector.broadcast %cst_30 : f32 to vector<1x3x16x16xf32>
    %42 = arith.select %40, %38, %41 : vector<1x3x16x16xi1>, vector<1x3x16x16xf32>
    %c0_31 = arith.constant 0 : index
    %c0_32 = arith.constant 0 : index
    %c0_33 = arith.constant 0 : index
    %c0_34 = arith.constant 0 : index
    %43 = vector.load %arg10[%c0_31, %c0_32, %c0_33, %c0_34] : memref<1x3x16x16xf32, #tpu.memory_space<vmem>>, vector<1x3x16x16xf32>
    tpu.vector_store %arg10[%c0_31, %c0_32, %c0_33, %c0_34], %42 {strides = array<i32>} : memref<1x3x16x16xf32, #tpu.memory_space<vmem>>, vector<1x3x16x16xf32>,
    return
  }
  func.func @transform_0(%arg0: i32, %arg1: i32, %arg2: memref<4xi32, #tpu.memory_space<smem>>) -> (i32, i32, i32, i32) {
    %c0_i32 = arith.constant 0 : i32
    %c0_i32_0 = arith.constant 0 : i32
    %c0_i32_1 = arith.constant 0 : i32
    return %arg0, %c0_i32, %arg1, %c0_i32_0 : i32, i32, i32, i32
  }
  func.func @transform_1(%arg0: i32, %arg1: i32, %arg2: memref<4xi32, #tpu.memory_space<smem>>) -> (i32, i32, i32, i32) {
    %c0_i32 = arith.constant 0 : i32
    %c0_i32_0 = arith.constant 0 : i32
    %c0_i32_1 = arith.constant 0 : i32
    return %arg0, %c0_i32, %arg1, %c0_i32_0 : i32, i32, i32, i32
  }
  func.func @transform_2(%arg0: i32, %arg1: i32, %arg2: memref<4xi32, #tpu.memory_space<smem>>) -> (i32, i32, i32, i32) {
    %c0_i32 = arith.constant 0 : i32
    %c0_i32_0 = arith.constant 0 : i32
    %c0_i32_1 = arith.constant 0 : i32
    return %arg0, %c0_i32, %arg1, %c0_i32_0 : i32, i32, i32, i32
  }
  func.func @transform_3(%arg0: i32, %arg1: i32, %arg2: memref<4xi32, #tpu.memory_space<smem>>) -> (i32, i32, i32, i32) {
    %c0_i32 = arith.constant 0 : i32
    %c0_i32_0 = arith.constant 0 : i32
    %c0_i32_1 = arith.constant 0 : i32
    return %arg0, %c0_i32, %arg1, %c0_i32_0 : i32, i32, i32, i32
  }
  func.func @transform_4(%arg0: i32, %arg1: i32, %arg2: memref<4xi32, #tpu.memory_space<smem>>) -> (i32, i32, i32, i32) {
    %c0_i32 = arith.constant 0 : i32
    %c0_i32_0 = arith.constant 0 : i32
    %c0_i32_1 = arith.constant 0 : i32
    return %arg0, %c0_i32, %arg1, %c0_i32_0 : i32, i32, i32, i32
  }
  func.func @transform_5(%arg0: i32, %arg1: i32, %arg2: memref<4xi32, #tpu.memory_space<smem>>) -> (i32, i32, i32, i32) {
    %c0_i32 = arith.constant 0 : i32
    %c0_i32_0 = arith.constant 0 : i32
    %c0_i32_1 = arith.constant 0 : i32
    return %arg0, %c0_i32, %arg1, %c0_i32_0 : i32, i32, i32, i32
  }
  func.func @transform_6(%arg0: i32, %arg1: i32, %arg2: memref<4xi32, #tpu.memory_space<smem>>) -> (i32, i32, i32, i32) {
    %c0_i32 = arith.constant 0 : i32
    %c0_i32_0 = arith.constant 0 : i32
    %c0_i32_1 = arith.constant 0 : i32
    return %arg0, %c0_i32, %arg1, %c0_i32_0 : i32, i32, i32, i32
  }
  func.func @transform_7(%arg0: i32, %arg1: i32, %arg2: memref<4xi32, #tpu.memory_space<smem>>) -> (i32, i32, i32, i32) {
    %c0_i32 = arith.constant 0 : i32
    %c0_i32_0 = arith.constant 0 : i32
    %c0_i32_1 = arith.constant 0 : i32
    return %arg0, %c0_i32, %arg1, %c0_i32_0 : i32, i32, i32, i32
  }
}

</mosaic_0001>

<bundles_post_ra>
// kernel: tpu_custom_call.1
= control target key start
LH: loop header
LB: loop body
LE: loop exit
PB: predicated region body
PF: predicated region fallthrough
CT: control target
= control target key end

     0   :  { %s1372_s27 = smov [#allocation3]   ;;  %s1992_s0 = inlined_call_operand.hbm [shape: s32[4], index: 0, kind: input, shape index: {}]   ;;  %s1993_s1 = inlined_call_operand.hbm [shape: f32[2,3,16,16], index: 1, kind: input, shape index: {}]   ;;  %s1994_s2 = inlined_call_operand.hbm [shape: f32[2,3,16,16], index: 2, kind: input, shape index: {}]   ;;  %s1995_s3 = inlined_call_operand.hbm [shape: f32[2,3,16,16], index: 3, kind: input, shape index: {}]   ;;  %s1996_s4 = inlined_call_operand.hbm [shape: f32[2,3,16,16], index: 4, kind: input, shape index: {}]   ;;  %s1997_s5 = inlined_call_operand.hbm [shape: f32[2,3,16,16], index: 5, kind: output, shape index: {0}]   ;;  %s1998_s6 = inlined_call_operand.hbm [shape: f32[2,3,16,16], index: 6, kind: output, shape index: {1}]   ;;  %s1999_s7 = inlined_call_operand.hbm [shape: f32[2,3,16,16], index: 7, kind: output, shape index: {2}]   ;;  %s2000_s8 = inlined_call_operand.hbm [shape: f32[2,3,16,16], index: 8, kind: output, shape index: {3}]  }
   0x1   :  { %2012 = sst [smem:[#allocation32_spill]] %s1994_s2 }
   0x2   :  { %2013 = sst [smem:[#allocation33_spill]] %s2000_s8 }
   0x3   :  { %15 = dma.hbm_to_smem %s1992_s0, 16, %s1372_s27, [#allocation2] }
   0x4   :  { %1322 = dma.done.wait [#allocation2], 16 }
   0x5   :  { %1323 = vsyncadd [#allocation2], 4294967280 }
   0x6   :  { %17 = sfence }
   0x7   :  { %18 = vsyncpa [#allocation5], 0 }
   0x8   :  { %20 = vsyncpa [#allocation5 + $0x1], 0 }
   0x9   :  { %21 = vsyncpa [#allocation8], 0 }
   0xa   :  { %23 = vsyncpa [#allocation8 + $0x1], 0 }
   0xb   :  { %24 = vsyncpa [#allocation11], 0 }
   0xc   :  { %26 = vsyncpa [#allocation11 + $0x1], 0 }
   0xd   :  { %27 = vsyncpa [#allocation6], 0 }
   0xe   :  { %29 = vsyncpa [#allocation6 + $0x1], 0 }
   0xf   :  { %30 = vsyncpa [#allocation14], 0 }
  0x10   :  { %32 = vsyncpa [#allocation14 + $0x1], 0 }
  0x11   :  { %33 = vsyncpa [#allocation17], 0 }
  0x12   :  { %35 = vsyncpa [#allocation17 + $0x1], 0  ;;  %s1433_s30 = smov 0   ;;  %s1435_s9 = smov 0  }
  0x13   :  { %s1437_s0 = smov 0   ;;  %s1439_s10 = smov 0  }
  0x14   :  { %s1441_s11 = smov 0   ;;  %s1443_s12 = smov 0  }
  0x15 LB: > { %2014 = sst [smem:[#allocation25_spill]] %s1350_s30  ;;  %s1464_s13 = sadd.s32 4294967295, %s1370_s12   ;;  %s1370_s12 = sphi %s1443_s12, %s41_s12   ;;  %s1366_s11 = sphi %s1441_s11, %s2054_s11   ;;  %s1362_s10 = sphi %s1439_s10, %s2053_s10   ;;  %s1358_s0 = sphi %s1437_s0, %s2052_s0   ;;  %s1354_s9 = sphi %s1435_s9, %s2056_s9   ;;  %s1350_s30 = sphi %s1433_s30, %s2055_s30  }
  0x16   : > { %2015 = sst [smem:[#allocation26_spill]] %s1358_s0  ;;  %s2001_s14 = sadd.s32 4294967294, %s1370_s12  }
  0x17   : > { %2016 = sst [smem:[#allocation27_spill]] %s1366_s11  ;;  %s53_s15 = sadd.s32 1, %s1366_s11 }
  0x18   : > { %s62_s16 = sadd.s32 1, %s1358_s0  ;;  %p55_p0 = scmp.ge.s32.totalorder %s53_s15, 2 }
  0x19   : > { %p69_p1 = scmp.ne.s32.totalorder %s1358_s0, %s1354_s9  ;;  %p70_p2 = scmp.eq.s32.totalorder %s1370_s12, 0 }
  0x1a   : > { %p75_p3 = scmp.ne.s32.totalorder %s1354_s9, %s1350_s30  ;;  %s2058_s15 = smov (%p55_p0, %s53_s15), 0 }
  0x1b   : > { %2017 = sst [smem:[#allocation28_spill]] %s2058_s15  ;;  %p1476_p4 = por %p70_p2, %p69_p1 }
  0x1c   : > { %p76_p5 = scmp.eq.s32.totalorder %s1464_s13, 0  ;;  %s57_s18 = ssub.s32 %s1366_s11, %s2058_s15 }
  0x1d   : > { %p185_p6 = scmp.eq.s32.totalorder %s1464_s13, 1  ;;  %p60_p7 = scmp.eq.s32.totalorder %s57_s18, 0 }
  0x1e   : > { %p1484_p8 = por %p76_p5, %p75_p3  ;;  %p191_p10 = scmp.eq.s32.totalorder %s2001_s14, 1 }
  0x1f   : > { %p1488_p9 = por %p185_p6, %p69_p1  ;;  %p1019_p13 = scmp.lt.s32.totalorder %s1370_s12, 2 }
  0x20   : > { %s1495_s21 = scalar_select %p60_p7, %s1358_s0, %s62_s16  }
  0x21   : > { %s2020_s20 = scalar_select %p1488_p9, 1, 0 }
  0x22   : > { %2022 = sst [smem:[#allocation30_spill]] %s1495_s21  ;;  %p1497_p11 = por %p191_p10, %p75_p3 }
  0x23   : > { %2021 = sst [smem:[#allocation29_spill]] %s2020_s20  ;;  %s1504_s23 = sand.u32 1, %s1358_s0  }
  0x24   : > { %s2023_s22 = scalar_select %p1497_p11, 1, 0 }
  0x25   : > { %s1507_s24 = smul.u32 48, %s1504_s23  ;;  %p1514_p0 = pnand %p1019_p13, %p1476_p4 }
  0x26   : > { %2024 = sst [smem:[#allocation31_spill]] %s2023_s22  ;;  %s1510_s25 = smul.u32 768, %s1366_s11 }
  0x27   : > { %s318_s27 = sand.u32 1, %s1370_s12   ;;  %s2026_s2 = sld [smem:[#allocation32_spill]] }
  0x28   : > { %s322_s18 = scalar_lea.vmem [#allocation7], %s1507_s24  ;;  %p954_p1 = scmp.ge.s32.totalorder %s1370_s12, 1 }
  0x29   : > { %s331_s14 = sshll.u32 %s322_s18, 4  ;;  %p385_p2 = scmp.lt.s32.totalorder %s1370_s12, 3  ;;  %s332_s14 = int_to_ptr.vmem [resolvable:$true] %s331_s14 }
  0x2a   : > { %s1526_s15 = scalar_lea.sflag [#allocation8], %s318_s27  ;;  %p1084_p3 = pneg %p1514_p0 }
  0x2b   : > { %s1095_s17 = scalar_lea.vmem %s332_s14, 768  ;;  %s1373_s11 = smov [#allocation7]  }
  0x2c   : > { %p1096_p4 = scmp.ne.s32.totalorder %s332_s14, %s1095_s17  ;;  %s1100_s21 = sshll.u32 %s1373_s11, 4  ;;  %s1101_s21 = int_to_ptr.vmem [resolvable:$false] %s1100_s21 }
  0x2d   : > { %s330_s16 = scalar_lea.hbm %s2026_s2, %s1510_s25  ;;  %s1102_s28 = scalar_lea.vmem %s1101_s21, 1536 }
  0x2e   : > { %p1098_p5 = pnand %p1096_p4, %p1084_p3  ;;  %p1103_p7 = scmp.lt.s32.totalorder %s332_s14, %s1101_s21 }
  0x2f   : > { %p1104_p10 = scmp.lt.s32.totalorder %s1102_s28, %s1095_s17 }
  0x30   : > { %p1099_p6 = pneg %p1098_p5 }
  0x31   : > { %p1105_p13 = por %p1104_p10, %p1103_p7 }
  0x33   : > { %p1106_p12 = pnand %p1105_p13, %p1099_p6 }
  0x35   : > { %1109 = shalt.err (!%p1106_p12)
}
  0x36   : > { %s2010_s29 = smov 128   ;;  %s1375_s27 = smov 8  }
  0x37   : > { %999 = dma.hbm_to_vmem [thread:$0]  (!%p1514_p0), %s330_s16, 768, %s332_s14, %s1526_s15, %s2010_s29, %s2010_s29, %s1375_s27  }
  0x38   : > { %p1543_p4 = pnand %p954_p1, %p385_p2  ;;  %s307_s17 = scalar_lea.hbm %s1993_s1, %s1510_s25 }
  0x39   : > { %s299_s28 = scalar_lea.vmem [#allocation4], %s1507_s24  ;;  %s353_s30 = scalar_lea.hbm %s1995_s3, %s1510_s25 }
  0x3a   : > { %s308_s2 = sshll.u32 %s299_s28, 4  ;;  %s296_s8 = scalar_lea.sflag [#allocation5], %s1504_s23  ;;  %s309_s2 = int_to_ptr.vmem [resolvable:$true] %s308_s2 }
  0x3b   : > { %s1123_s20 = scalar_lea.vmem %s309_s2, 768  ;;  %s1376_s14 = smov [#allocation4]  }
  0x3c   : > { %p1124_p12 = scmp.ne.s32.totalorder %s309_s2, %s1123_s20  ;;  %s1128_s16 = sshll.u32 %s1376_s14, 4  ;;  %s1129_s16 = int_to_ptr.vmem [resolvable:$false] %s1128_s16 }
  0x3d   : > { %s1130_s29 = scalar_lea.vmem %s1129_s16, 1536  ;;  %p1131_p5 = scmp.lt.s32.totalorder %s309_s2, %s1129_s16 }
  0x3e   : > { %p1126_p1 = pnand %p1124_p12, %p1084_p3  ;;  %p1132_p6 = scmp.lt.s32.totalorder %s1130_s29, %s1123_s20 }
  0x40   : > { %p1127_p2 = pneg %p1126_p1  ;;  %p1133_p7 = por %p1132_p6, %p1131_p5 }
  0x42   : > { %p1134_p10 = pnand %p1133_p7, %p1127_p2 }
  0x44   : > { %1137 = shalt.err (!%p1134_p10)
}
  0x45   : > { %s2028_s0 = smov 128   ;;  %s345_s22 = scalar_lea.vmem [#allocation9], %s1507_s24 }
  0x46   : > { %996 = dma.hbm_to_vmem [thread:$0]  (!%p1514_p0), %s307_s17, 768, %s309_s2, %s296_s8, %s2028_s0, %s2028_s0, %s1375_s27  }
  0x47   : > { %s354_s21 = sshll.u32 %s345_s22, 4  ;;  %s1377_s20 = smov [#allocation9]   ;;  %s355_s21 = int_to_ptr.vmem [resolvable:$true] %s354_s21 }
  0x48   : > { %s1151_s18 = scalar_lea.vmem %s355_s21, 768  ;;  %s1156_s29 = sshll.u32 %s1377_s20, 4  ;;  %s1157_s29 = int_to_ptr.vmem [resolvable:$false] %s1156_s29 }
  0x49   : > { %p1152_p13 = scmp.ne.s32.totalorder %s355_s21, %s1151_s18  ;;  %s1158_s28 = scalar_lea.vmem %s1157_s29, 1536 }
  0x4a   : > { %p1159_p2 = scmp.lt.s32.totalorder %s355_s21, %s1157_s29  ;;  %p1160_p5 = scmp.lt.s32.totalorder %s1158_s28, %s1151_s18 }
  0x4b   : > { %p1154_p12 = pnand %p1152_p13, %p1084_p3 }
  0x4c   : > { %p1161_p6 = por %p1160_p5, %p1159_p2 }
  0x4d   : > { %p1155_p1 = pneg %p1154_p12 }
  0x4f   : > { %p1162_p7 = pnand %p1161_p6, %p1155_p1 }
  0x51   : > { %1165 = shalt.err (!%p1162_p7)
}
  0x52   : > { %1002 = dma.hbm_to_vmem [thread:$0]  (!%p1514_p0), %s353_s30, 768, %s355_s21, %s1526_s15, %s2028_s0, %s2028_s0, %s1375_s27  }
  0x53   : > { %s376_s16 = scalar_lea.hbm %s1996_s4, %s1510_s25  ;;  %s368_s22 = scalar_lea.vmem [#allocation10], %s1507_s24 }
  0x54   : > { %s377_s18 = sshll.u32 %s368_s22, 4  ;;  %s365_s20 = scalar_lea.sflag [#allocation11], %s1504_s23  ;;  %s378_s18 = int_to_ptr.vmem [resolvable:$true] %s377_s18 }
  0x55   : > { %s1179_s29 = scalar_lea.vmem %s378_s18, 768  ;;  %s1378_s28 = smov [#allocation10]  }
  0x56   : > { %p1180_p10 = scmp.ne.s32.totalorder %s378_s18, %s1179_s29  ;;  %s1184_s2 = sshll.u32 %s1378_s28, 4  ;;  %s1185_s2 = int_to_ptr.vmem [resolvable:$false] %s1184_s2 }
  0x57   : > { %s1186_s8 = scalar_lea.vmem %s1185_s2, 1536  ;;  %p1187_p1 = scmp.lt.s32.totalorder %s378_s18, %s1185_s2 }
  0x58   : > { %p1182_p13 = pnand %p1180_p10, %p1084_p3  ;;  %p1188_p2 = scmp.lt.s32.totalorder %s1186_s8, %s1179_s29 }
  0x5a   : > { %p1183_p12 = pneg %p1182_p13  ;;  %p1189_p5 = por %p1188_p2, %p1187_p1 }
  0x5c   : > { %p1190_p6 = pnand %p1189_p5, %p1183_p12 }
  0x5e   : > { %1193 = shalt.err (!%p1190_p6)
}
  0x5f   : > { %1005 = dma.hbm_to_vmem [thread:$0]  (!%p1514_p0), %s376_s16, 768, %s378_s18, %s365_s20, %s2028_s0, %s2028_s0, %s1375_s27  }
  0x60   : > { %389 = sbr.rel (%p1543_p4) target bundleno = 216 (0xd8), region = 36  ;;  %s1597_s30 = sand.u32 (!%p1543_p4), 1, %s1354_s9  }
  0x61   : > { %s1600_s15 = smul.u32 (!%p1543_p4), 48, %s1597_s30  ;;  %s392_s23 = scalar_lea.sflag (!%p1543_p4), [#allocation5], %s1597_s30 }
  0x63   : > { %s1604_s24 = scalar_lea.vmem (!%p1543_p4), [#allocation4], %s1600_s15 }
  0x65   : > { %1325 = dma.done.wait (%p1484_p8), %s392_s23, 768  }
  0x66   : > { %1327 = vsyncadd (%p1484_p8), %s392_s23, 4294966528  ;;  %s400_s25 = sand.u32 1, %s1464_s13   ;;  %s1614_s27 = scalar_lea.vmem [#allocation7], %s1600_s15 }
  0x67   : > { %s401_s26 = scalar_lea.sflag [#allocation8], %s400_s25 }
  0x68   : > { %1329 = dma.done.wait (%p1484_p8), %s401_s26, 1536  }
  0x69   : > { %1331 = vsyncadd (%p1484_p8), %s401_s26, 4294965760  ;;  %s1621_s11 = scalar_lea.vmem [#allocation9], %s1600_s15  ;;  %s419_s0 = scalar_lea.sflag [#allocation11], %s1597_s30 }
  0x6a   : > { %s1625_s21 = scalar_lea.vmem [#allocation10], %s1600_s15 }
  0x6b   : > { %1333 = dma.done.wait (%p1484_p8), %s419_s0, 768  }
  0x6c   : > { %1335 = vsyncadd (%p1484_p8), %s419_s0, 4294966528  ;;  %v496_v0 = vlaneseq  ;;  %s491_s17 = sld [smem:[#allocation3]]  ;;  %v543_v9 = vld [vmem:[%s1614_s27] sm:$0xff]  ;;  %s1641_s19 = scalar_lea.vmem [#allocation13], %s1600_s15  ;;  %v545_v10 = vld [vmem:[%s1614_s27 + $0x10] sm:$0xff]  ;;  %vm536_vm8 = vcmask 130048  }
  0x6d   : > { %s955_s14 = sld [smem:[#allocation3 + $0x1]]  ;;  %s646_s18 = sshll.u32 %s1641_s19, 4  ;;  %v547_v11 = vld [vmem:[%s1614_s27 + $0x20] sm:$0xff]  ;;  %v522_v17 = vld [vmem:[%s1604_s24 + $0x10] sm:$0xff]  ;;  %v544_v19 = vld [vmem:[%s1614_s27 + $0x8] sm:$0xff]  ;;  %s1705_s18 = int_to_ptr.vmem [resolvable:$true] %s646_s18 }
  0x6e   : > { %v497_v1 = vshrl.u32 %v496_v0, 7  ;;  %s956_s16 = sld [smem:[#allocation3 + $0x2]]  ;;  %v503_v2 = vand.u32 127, %v496_v0  ;;  %s1647_s20 = scalar_lea.vmem [#allocation12], %s1600_s15  ;;  %v520_v16 = vld [vmem:[%s1604_s24] sm:$0xff]  ;;  %v546_v20 = vld [vmem:[%s1614_s27 + $0x18] sm:$0xff] }
  0x6f   : > { %s957_s22 = sld [smem:[#allocation3 + $0x3]]  ;;  %s628_s29 = sshll.u32 %s1647_s20, 4  ;;  %v548_v21 = vld [vmem:[%s1614_s27 + $0x28] sm:$0xff]  ;;  %v524_v23 = vld [vmem:[%s1604_s24 + $0x20] sm:$0xff]  ;;  %v523_v26 = vld [vmem:[%s1604_s24 + $0x18] sm:$0xff]  ;;  %s1719_s29 = int_to_ptr.vmem [resolvable:$true] %s628_s29 }
  0x70   : > { %v498_v3 = vadd.s32 8, %v497_v1  ;;  %s1669_s28 = scalar_lea.vmem [#allocation15], %s1600_s15  ;;  %s1673_s8 = scalar_lea.vmem [#allocation16], %s1600_s15  ;;  %v521_v22 = vld [vmem:[%s1604_s24 + $0x8] sm:$0xff]  ;;  %v561_v24 = vld [vmem:[%s1621_s11] sm:$0xff]  ;;  %v563_v29 = vld [vmem:[%s1621_s11 + $0x10] sm:$0xff] }
  0x71   : > { %s664_s2 = sshll.u32 %s1669_s28, 4  ;;  %s682_s23 = sshll.u32 %s1673_s8, 4  ;;  %v525_v27 = vld [vmem:[%s1604_s24 + $0x28] sm:$0xff]  ;;  %v564_v34 = vld [vmem:[%s1621_s11 + $0x18] sm:$0xff]  ;;  %v565_v35 = vld [vmem:[%s1621_s11 + $0x20] sm:$0xff]  ;;  %s1741_s2 = int_to_ptr.vmem [resolvable:$true] %s664_s2  ;;  %s1751_s23 = int_to_ptr.vmem [resolvable:$true] %s682_s23 }
  0x72   : > { %v504_v4 = vstv %s491_s17  ;;  %s1689_s15 = smul.u32 768, %s1362_s10  ;;  %v562_v28 = vld [vmem:[%s1621_s11 + $0x8] sm:$0xff]  ;;  %v579_v41 = vld [vmem:[%s1625_s21] sm:$0xff]  ;;  %v581_v46 = vld [vmem:[%s1625_s21 + $0x10] sm:$0xff]  ;;  %s2046_s24 = sld [smem:[#allocation33_spill]] }
  0x73   : > { %vm1631_vm0 = vcmp.ge.s32.totalorder %v497_v1, %v504_v4  ;;  %v507_v6 = vstv %s955_s14  ;;  %vm1658_vm4 = vcmp.ge.s32.totalorder %v498_v3, %v504_v4  ;;  %v1746_v40 = vld [vmem:[%s1621_s11 + $0x28] sm:$0xff]  ;;  %v582_v51 = vld [vmem:[%s1625_s21 + $0x18] sm:$0xff]  ;;  %v1793_v52 = vld [vmem:[%s1625_s21 + $0x20] sm:$0xff] }
  0x74   : > { %vm1635_vm1 = vcmp.lt.s32.totalorder %v497_v1, %v507_v6  ;;  %v512_v8 = vstv %s956_s16  ;;  %vm1662_vm5 = vcmp.lt.s32.totalorder %v498_v3, %v507_v6  ;;  %v580_v45 = vld [vmem:[%s1625_s21 + $0x8] sm:$0xff]  ;;  %s1777_s26 = scalar_lea.hbm %s1998_s6, %s1689_s15  ;;  %s1799_s0 = scalar_lea.hbm %s1997_s5, %s1689_s15 }
  0x75   : > { %vm510_vm2 = vmand %vm1631_vm0, %vm1635_vm1  ;;  %vm1654_vm3 = vcmp.ge.s32.totalorder %v503_v2, %v512_v8  ;;  %v516_v13 = vstv %s957_s22  ;;  %s1805_s16 = scalar_lea.hbm %s1999_s7, %s1689_s15  ;;  %v1824_v57 = vld [vmem:[%s1625_s21 + $0x28] sm:$0xff]  ;;  %s1851_s21 = scalar_lea.sflag [#allocation14], %s400_s25 }
  0x76   : > { %vm514_vm6 = vmand %vm510_vm2, %vm1654_vm3  ;;  %vm1678_vm7 = vcmp.lt.s32.totalorder %v503_v2, %v516_v13 }
  0x77   : > { %vm1693_vm9 = vmand %vm514_vm6, %vm1678_vm7 }
  0x78   : > { %v549_v30 = vsel %vm1693_vm9, %v543_v9, 0.0  ;;  %vm511_vm10 = vmand %vm1658_vm4, %vm1662_vm5  ;;  %v551_v31 = vsel %vm1693_vm9, %v545_v10, 0.0  ;;  %v553_v32 = vsel %vm1693_vm9, %v547_v11, 0.0  ;;  %v530_v33 = vsel %vm1693_vm9, %v520_v16, 0.0  ;;  %s1830_s27 = scalar_lea.hbm %s2046_s24, %s1689_s15  ;;  %s1379_s15 = smov [#allocation13]  }
  0x79   : > { %555 = vst.msk [vmem:[%s1641_s19] sm:$0xff] %vm536_vm8, %v549_v30  ;;  %vm515_vm11 = vmand %vm511_vm10, %vm1654_vm3  ;;  %v532_v36 = vsel %vm1693_vm9, %v522_v17, 0.0  ;;  %v534_v37 = vsel %vm1693_vm9, %v524_v23, 0.0  ;;  %v567_v38 = vsel %vm1693_vm9, %v561_v24, 0.0  ;;  %v569_v39 = vsel %vm1693_vm9, %v563_v29, 0.0  ;;  %s1198_s11 = sshll.u32 %s1379_s15, 4  ;;  %s1199_s11 = int_to_ptr.vmem [resolvable:$false] %s1198_s11 }
  0x7a   : > { %557 = vst.msk [vmem:[%s1641_s19 + $0x10] sm:$0xff] %vm536_vm8, %v551_v31  ;;  %559 = vst.msk [vmem:[%s1641_s19 + $0x20] sm:$0xff] %vm536_vm8, %v553_v32  ;;  %v571_v43 = vsel %vm1693_vm9, %v565_v35, 0.0  ;;  %v585_v44 = vsel %vm1693_vm9, %v579_v41, 0.0  ;;  %v587_v60 = vsel %vm1693_vm9, %v581_v46, 0.0  ;;  %s1200_s17 = scalar_lea.vmem %s1199_s11, 1536  ;;  %p1201_p4 = scmp.lt.s32.totalorder %s1705_s18, %s1199_s11 }
  0x7b   : > { %537 = vst.msk [vmem:[%s1647_s20] sm:$0xff] %vm536_vm8, %v530_v33  ;;  %vm1755_vm12 = vmand %vm515_vm11, %vm1678_vm7 }
  0x7c   : > { %539 = vst.msk [vmem:[%s1647_s20 + $0x10] sm:$0xff] %vm536_vm8, %v532_v36  ;;  %541 = vst.msk [vmem:[%s1647_s20 + $0x20] sm:$0xff] %vm536_vm8, %v534_v37  ;;  %v550_v47 = vsel %vm1755_vm12, %v544_v19, 0.0  ;;  %v552_v48 = vsel %vm1755_vm12, %v546_v20, 0.0  ;;  %v554_v49 = vsel %vm1755_vm12, %v548_v21, 0.0  ;;  %v531_v50 = vsel %vm1755_vm12, %v521_v22, 0.0 }
  0x7d   : > { %573 = vst.msk [vmem:[%s1669_s28] sm:$0xff] %vm536_vm8, %v567_v38  ;;  %575 = vst.msk [vmem:[%s1669_s28 + $0x10] sm:$0xff] %vm536_vm8, %v569_v39  ;;  %v533_v53 = vsel %vm1755_vm12, %v523_v26, 0.0  ;;  %v535_v54 = vsel %vm1755_vm12, %v525_v27, 0.0  ;;  %v568_v55 = vsel %vm1755_vm12, %v562_v28, 0.0  ;;  %v570_v56 = vsel %vm1755_vm12, %v564_v34, 0.0 }
  0x7e   : > { %577 = vst.msk [vmem:[%s1669_s28 + $0x20] sm:$0xff] %vm536_vm8, %v571_v43  ;;  %591 = vst.msk [vmem:[%s1673_s8] sm:$0xff] %vm536_vm8, %v585_v44  ;;  %v572_v58 = vsel %vm1755_vm12, %v1746_v40, 0.0  ;;  %v586_v59 = vsel %vm1755_vm12, %v580_v45, 0.0  ;;  %v588_v61 = vsel %vm1755_vm12, %v582_v51, 0.0 }
  0x7f   : > { %556 = vst.msk [vmem:[%s1641_s19 + $0x8] sm:$0xff] %vm536_vm8, %v550_v47  ;;  %558 = vst.msk [vmem:[%s1641_s19 + $0x18] sm:$0xff] %vm536_vm8, %v552_v48 }
  0x80   : > { %560 = vst.msk [vmem:[%s1641_s19 + $0x28] sm:$0xff] %vm536_vm8, %v554_v49  ;;  %538 = vst.msk [vmem:[%s1647_s20 + $0x8] sm:$0xff] %vm536_vm8, %v531_v50 }
  0x81   : > { %540 = vst.msk [vmem:[%s1647_s20 + $0x18] sm:$0xff] %vm536_vm8, %v533_v53  ;;  %542 = vst.msk [vmem:[%s1647_s20 + $0x28] sm:$0xff] %vm536_vm8, %v535_v54  ;;  %s1194_s20 = scalar_lea.vmem %s1705_s18, 768 }
  0x82   : > { %574 = vst.msk [vmem:[%s1669_s28 + $0x8] sm:$0xff] %vm536_vm8, %v568_v55  ;;  %576 = vst.msk [vmem:[%s1669_s28 + $0x18] sm:$0xff] %vm536_vm8, %v570_v56  ;;  %p1195_p8 = scmp.ne.s32.totalorder %s1705_s18, %s1194_s20  ;;  %p1202_p7 = scmp.lt.s32.totalorder %s1200_s17, %s1194_s20 }
  0x84   : > { %p1196_p0 = pnand %p1195_p8, %p1488_p9  ;;  %p1203_p10 = por %p1202_p7, %p1201_p4 }
  0x86   : > { %p1197_p3 = pneg %p1196_p0 }
  0x88   : > { %p1204_p13 = pnand %p1203_p10, %p1197_p3 }
  0x8a   : > { %1207 = shalt.err (!%p1204_p13)
}
  0x8b   : > { %s1208_s13 = scalar_lea.hbm %s1777_s26, 768  ;;  %s1212_s19 = scalar_lea.hbm %s1998_s6, 1536 }
  0x8c   : > { %p1209_p12 = scmp.ne.s32.totalorder %s1777_s26, %s1208_s13  ;;  %p1213_p5 = scmp.lt.s32.totalorder %s1777_s26, %s1998_s6 }
  0x8d   : > { %p1214_p6 = scmp.lt.s32.totalorder %s1212_s19, %s1208_s13 }
  0x8e   : > { %p1210_p1 = pnand %p1209_p12, %p1488_p9 }
  0x8f   : > { %p1215_p8 = por %p1214_p6, %p1213_p5 }
  0x90   : > { %p1211_p2 = pneg %p1210_p1 }
  0x92   : > { %p1216_p0 = pnand %p1215_p8, %p1211_p2 }
  0x94   : > { %1219 = shalt.err (!%p1216_p0)
}
  0x95   : > { %s1380_s20 = smov 128   ;;  %s1381_s11 = smov 8   ;;  %578 = vst.msk [vmem:[%s1669_s28 + $0x28] sm:$0xff] %vm536_vm8, %v572_v58  ;;  %592 = vst.msk [vmem:[%s1673_s8 + $0x8] sm:$0xff] %vm536_vm8, %v586_v59  ;;  %v589_v62 = vsel %vm1693_vm9, %v1793_v52, 0.0  ;;  %v590_v63 = vsel %vm1755_vm12, %v1824_v57, 0.0 }
  0x96   : > { %986 = dma.vmem_to_hbm [thread:$0]  (%p1488_p9), %s1705_s18, 768, %s1777_s26, %s1851_s21, %s1380_s20, %s1380_s20, %s1381_s11  }
  0x97   : > { %593 = vst.msk [vmem:[%s1673_s8 + $0x10] sm:$0xff] %vm536_vm8, %v587_v60  ;;  %594 = vst.msk [vmem:[%s1673_s8 + $0x18] sm:$0xff] %vm536_vm8, %v588_v61  ;;  %s598_s17 = scalar_lea.sflag [#allocation6], %s1597_s30  ;;  %s1220_s13 = scalar_lea.vmem %s1719_s29, 768 }
  0x98   : > { %p1221_p3 = scmp.ne.s32.totalorder %s1719_s29, %s1220_s13  ;;  %s1382_s18 = smov [#allocation12]  }
  0x99   : > { %s1224_s28 = sshll.u32 %s1382_s18, 4  ;;  %s1225_s28 = int_to_ptr.vmem [resolvable:$false] %s1224_s28 }
  0x9a   : > { %p1222_p4 = pnand %p1221_p3, %p1488_p9  ;;  %s1226_s26 = scalar_lea.vmem %s1225_s28, 1536 }
  0x9b   : > { %p1227_p10 = scmp.lt.s32.totalorder %s1719_s29, %s1225_s28  ;;  %p1228_p13 = scmp.lt.s32.totalorder %s1226_s26, %s1220_s13 }
  0x9c   : > { %p1223_p7 = pneg %p1222_p4 }
  0x9d   : > { %p1229_p12 = por %p1228_p13, %p1227_p10 }
  0x9f   : > { %p1230_p1 = pnand %p1229_p12, %p1223_p7 }
  0xa1   : > { %1233 = shalt.err (!%p1230_p1)
}
  0xa2   : > { %s1234_s25 = scalar_lea.hbm %s1799_s0, 768  ;;  %s1238_s10 = scalar_lea.hbm %s1997_s5, 1536 }
  0xa3   : > { %p1235_p2 = scmp.ne.s32.totalorder %s1799_s0, %s1234_s25  ;;  %p1239_p8 = scmp.lt.s32.totalorder %s1799_s0, %s1997_s5 }
  0xa4   : > { %p1240_p0 = scmp.lt.s32.totalorder %s1238_s10, %s1234_s25 }
  0xa5   : > { %p1236_p5 = pnand %p1235_p2, %p1488_p9 }
  0xa6   : > { %p1241_p3 = por %p1240_p0, %p1239_p8 }
  0xa7   : > { %p1237_p6 = pneg %p1236_p5 }
  0xa9   : > { %p1242_p4 = pnand %p1241_p3, %p1237_p6 }
  0xab   : > { %1245 = shalt.err (!%p1242_p4)
}
  0xac   : > { %985 = dma.vmem_to_hbm [thread:$0]  (%p1488_p9), %s1719_s29, 768, %s1799_s0, %s598_s17, %s1380_s20, %s1380_s20, %s1381_s11  }
  0xad   : > { %595 = vst.msk [vmem:[%s1673_s8 + $0x20] sm:$0xff] %vm536_vm8, %v589_v62  ;;  %596 = vst.msk [vmem:[%s1673_s8 + $0x28] sm:$0xff] %vm536_vm8, %v590_v63  ;;  %s1246_s13 = scalar_lea.vmem %s1741_s2, 768  ;;  %s1383_s28 = smov [#allocation15]  }
  0xae   : > { %p1247_p7 = scmp.ne.s32.totalorder %s1741_s2, %s1246_s13  ;;  %s1250_s26 = sshll.u32 %s1383_s28, 4  ;;  %s1251_s26 = int_to_ptr.vmem [resolvable:$false] %s1250_s26 }
  0xaf   : > { %s1252_s25 = scalar_lea.vmem %s1251_s26, 1536  ;;  %p1253_p12 = scmp.lt.s32.totalorder %s1741_s2, %s1251_s26 }
  0xb0   : > { %p1248_p10 = pnand %p1247_p7, %p1488_p9  ;;  %p1254_p1 = scmp.lt.s32.totalorder %s1252_s25, %s1246_s13 }
  0xb2   : > { %p1249_p13 = pneg %p1248_p10  ;;  %p1255_p2 = por %p1254_p1, %p1253_p12 }
  0xb4   : > { %p1256_p5 = pnand %p1255_p2, %p1249_p13 }
  0xb6   : > { %1259 = shalt.err (!%p1256_p5)
}
  0xb7   : > { %s1260_s29 = scalar_lea.hbm %s1805_s16, 768  ;;  %s1264_s17 = scalar_lea.hbm %s1999_s7, 1536 }
  0xb8   : > { %p1261_p6 = scmp.ne.s32.totalorder %s1805_s16, %s1260_s29  ;;  %p1265_p3 = scmp.lt.s32.totalorder %s1805_s16, %s1999_s7 }
  0xb9   : > { %p1266_p4 = scmp.lt.s32.totalorder %s1264_s17, %s1260_s29 }
  0xba   : > { %p1262_p8 = pnand %p1261_p6, %p1488_p9 }
  0xbb   : > { %p1267_p7 = por %p1266_p4, %p1265_p3 }
  0xbc   : > { %p1263_p0 = pneg %p1262_p8 }
  0xbe   : > { %p1268_p10 = pnand %p1267_p7, %p1263_p0 }
  0xc0   : > { %1271 = shalt.err (!%p1268_p10)
}
  0xc1   : > { %987 = dma.vmem_to_hbm [thread:$0]  (%p1488_p9), %s1741_s2, 768, %s1805_s16, %s1851_s21, %s1380_s20, %s1380_s20, %s1381_s11  }
  0xc2   : > { %s613_s10 = scalar_lea.sflag [#allocation17], %s1597_s30  ;;  %s1272_s15 = scalar_lea.vmem %s1751_s23, 768 }
  0xc3   : > { %p1273_p13 = scmp.ne.s32.totalorder %s1751_s23, %s1272_s15  ;;  %s1384_s18 = smov [#allocation16]  }
  0xc4   : > { %s1276_s13 = sshll.u32 %s1384_s18, 4  ;;  %s1277_s13 = int_to_ptr.vmem [resolvable:$false] %s1276_s13 }
  0xc5   : > { %p1274_p12 = pnand %p1273_p13, %p1488_p9  ;;  %s1278_s28 = scalar_lea.vmem %s1277_s13, 1536 }
  0xc6   : > { %p1279_p2 = scmp.lt.s32.totalorder %s1751_s23, %s1277_s13  ;;  %p1280_p5 = scmp.lt.s32.totalorder %s1278_s28, %s1272_s15 }
  0xc7   : > { %p1275_p1 = pneg %p1274_p12 }
  0xc8   : > { %p1281_p6 = por %p1280_p5, %p1279_p2 }
  0xca   : > { %p1282_p8 = pnand %p1281_p6, %p1275_p1 }
  0xcc   : > { %1285 = shalt.err (!%p1282_p8)
}
  0xcd   : > { %s1286_s2 = scalar_lea.hbm %s1830_s27, 768  ;;  %s1290_s21 = scalar_lea.hbm %s2046_s24, 1536 }
  0xce   : > { %p1287_p0 = scmp.ne.s32.totalorder %s1830_s27, %s1286_s2  ;;  %p1291_p7 = scmp.lt.s32.totalorder %s1830_s27, %s2046_s24 }
  0xcf   : > { %p1292_p10 = scmp.lt.s32.totalorder %s1290_s21, %s1286_s2 }
  0xd0   : > { %p1288_p3 = pnand %p1287_p0, %p1488_p9 }
  0xd1   : > { %p1293_p13 = por %p1292_p10, %p1291_p7 }
  0xd2   : > { %p1289_p4 = pneg %p1288_p3 }
  0xd4   : > { %p1294_p12 = pnand %p1293_p13, %p1289_p4 }
  0xd6   : > { %1297 = shalt.err (!%p1294_p12)
}
  0xd7   : > { %988 = dma.vmem_to_hbm [thread:$0]  (%p1488_p9), %s1751_s23, 768, %s1830_s27, %s613_s10, %s1380_s20, %s1380_s20, %s1381_s11  }
  0xd8 PF: > { %s2047_s29 = sld [smem:[#allocation25_spill]]  ;;  %p2049_p1 = scmp.ge.s32.totalorder %s1370_s12, 2 }
  0xda   : > { %p1007_p2 = pnand %p2049_p1, %p1497_p11 }
  0xdc   : > { %p1008_p5 = pneg %p1007_p2 }
  0xde   : > { %s697_s0 = sand.u32 1, %s2047_s29  }
  0xdf   : > { %s698_s17 = scalar_lea.sflag [#allocation6], %s697_s0 }
  0xe0   : > { %1337 = dma.done.wait (%p1008_p5), %s698_s17, 768  }
  0xe1   : > { %1339 = vsyncadd (%p1008_p5), %s698_s17, 4294966528  ;;  %s2050_s22 = sadd.s32 4294967294, %s1370_s12  }
  0xe2   : > { %s706_s14 = sand.u32 1, %s2050_s22  }
  0xe3   : > { %s707_s19 = scalar_lea.sflag [#allocation14], %s706_s14 }
  0xe4   : > { %1341 = dma.done.wait (%p1008_p5), %s707_s19, 1536  }
  0xe5   : > { %1343 = vsyncadd (%p1008_p5), %s707_s19, 4294965760  ;;  %s725_s15 = scalar_lea.sflag [#allocation17], %s697_s0 }
  0xe6   : > { %1345 = dma.done.wait (%p1008_p5), %s725_s15, 768  }
  0xe7   : > { %1347 = vsyncadd (%p1008_p5), %s725_s15, 4294966528  ;;  %s41_s12 = sadd.s32 1, %s1370_s12   ;;  %s2051_s23 = sld [smem:[#allocation26_spill]] }
  0xe8   : > { %p38_p9 = scmp.ge.s32.totalorder %s41_s12, 4   ;;  %s2052_s0 = sld [smem:[#allocation30_spill]] }
  0xe9   : > { %s2053_s10 = sld [smem:[#allocation27_spill]]  ;;  %s2055_s30 = smov %s1354_s9 }
  0xea   : > { %s2054_s11 = sld [smem:[#allocation28_spill]]  ;;  %40 = sbr.rel (!%p38_p9) target bundleno = 21 (0x15), region = 167 }
  0xed   : > { %s2056_s9 = smov %s2051_s23 }
  0xef   :  { %730 = vsyncpa [#allocation5], 1 }
  0xf0   :  { %732 = vsyncpa [#allocation5 + $0x1], 1 }
  0xf1   :  { %733 = vsyncpa [#allocation8], 1 }
  0xf2   :  { %735 = vsyncpa [#allocation8 + $0x1], 1 }
  0xf3   :  { %736 = vsyncpa [#allocation11], 1 }
  0xf4   :  { %738 = vsyncpa [#allocation11 + $0x1], 1 }
  0xf5   :  { %739 = vsyncpa [#allocation6], 1 }
  0xf6   :  { %741 = vsyncpa [#allocation6 + $0x1], 1 }
  0xf7   :  { %742 = vsyncpa [#allocation14], 1 }
  0xf8   :  { %744 = vsyncpa [#allocation14 + $0x1], 1 }
  0xf9   :  { %745 = vsyncpa [#allocation17], 1 }
  0xfa   :  { %747 = vsyncpa [#allocation17 + $0x1], 1 }

</bundles_post_ra>
